<compile_context>
chip_gen: v7x
topology: tpu7x:2x2x1
jax: 0.10.0
libtpu: 0.0.40
codegen_flags: <defaults>
</compile_context>

<pallas_src>
import functools

import jax
import jax.numpy as jnp
from jax import lax
from jax.experimental import pallas as pl
from jax.experimental.pallas import tpu as pltpu

_LANE = 128
# Explicit scoped-VMEM request with headroom: fits under v7x's 64 MiB physical VMEM and
# is far above what tile<=1024 with 128-wide features needs on v5e/v6e.
_VMEM_LIMIT = 48 * 1024 * 1024


def _round_up(n, m):
    return ((n + m - 1) // m) * m


def _pad_to(x, shape):
    return jnp.pad(x, [(0, t - s) for s, t in zip(x.shape, shape)])


# ---------------------------------------------------------------------------
# Kernels
# ---------------------------------------------------------------------------

def _xw_kernel(x_ref, w_ref, o_ref):
    """Feature transform tile: o[i] = (x[i] @ W), bf16 out, f32 MXU accumulation.

    Hoisted out of the propagation loop so it runs once per layer instead of
    N/tm times (it used to be recomputed for every row tile)."""
    o_ref[...] = jnp.dot(x_ref[...], w_ref[...],
                         preferred_element_type=jnp.float32).astype(o_ref.dtype)


def _gcn_prop_kernel(a_ref, xw_ref, b_ref, o_ref, acc_ref, *, apply_relu):
    """Propagation tile: o[i] = (relu)( sum_k A[i,k] @ XW[k] + b )."""
    k = pl.program_id(1)

    @pl.when(k == 0)
    def _():
        acc_ref[...] = jnp.zeros_like(acc_ref)

    # (tm, tk) bf16 @ (tk, H) bf16 -> f32 accumulate.
    acc_ref[...] += jnp.dot(a_ref[...], xw_ref[...],
                            preferred_element_type=jnp.float32)

    @pl.when(k == pl.num_programs(1) - 1)
    def _():
        out = acc_ref[...] + b_ref[...]      # bias broadcast once per i-tile
        if apply_relu:
            out = jnp.maximum(out, 0.0)
        o_ref[...] = out.astype(o_ref.dtype)


def _decoder_kernel(zi_ref, zj_ref, adj_ref):
    """Inner-product decoder tile: adj[i,j] = sigmoid(z_i @ z_j^T).

    Takes f32 z tiles and casts to bf16 per-tile (hides under the writeback of the
    mem-bound decoder; avoids a separate full-array z->bf16 XLA pass)."""
    zi = zi_ref[...].astype(jnp.bfloat16)
    zj = zj_ref[...].astype(jnp.bfloat16)
    logits = lax.dot_general(
        zi, zj,
        dimension_numbers=(((1,), (1,)), ((), ())),   # contract feature dim, no transpose
        preferred_element_type=jnp.float32)
    adj_ref[...] = jax.nn.sigmoid(logits).astype(adj_ref.dtype)


# ---------------------------------------------------------------------------
# pallas_call wrappers
# ---------------------------------------------------------------------------

def _feature_transform(x_bf16, w_bf16, *, tm):
    n_pad, d_pad = x_bf16.shape
    h_pad = w_bf16.shape[1]
    return pl.pallas_call(
        _xw_kernel,
        grid=(n_pad // tm,),
        in_specs=[
            pl.BlockSpec((tm, d_pad), lambda i: (i, 0)),      # node-feature tile
            pl.BlockSpec((d_pad, h_pad), lambda i: (0, 0)),   # weights (small, resident)
        ],
        out_specs=pl.BlockSpec((tm, h_pad), lambda i: (i, 0)),
        out_shape=jax.ShapeDtypeStruct((n_pad, h_pad), jnp.bfloat16),
        compiler_params=pltpu.CompilerParams(
            dimension_semantics=("parallel",),
            vmem_limit_bytes=_VMEM_LIMIT),
    )(x_bf16, w_bf16)


def _gcn_propagate(a_bf16, xw_bf16, b_f32, *, apply_relu, out_dtype, tm, tk):
    n_pad = a_bf16.shape[0]
    h_pad = xw_bf16.shape[1]
    kernel = functools.partial(_gcn_prop_kernel, apply_relu=apply_relu)
    return pl.pallas_call(
        kernel,
        grid=(n_pad // tm, n_pad // tk),          # K (reduction) axis last
        in_specs=[
            pl.BlockSpec((tm, tk), lambda i, k: (i, k)),      # A_hat tile
            pl.BlockSpec((tk, h_pad), lambda i, k: (k, 0)),   # precomputed XW slab
            pl.BlockSpec((1, h_pad), lambda i, k: (0, 0)),    # bias
        ],
        out_specs=pl.BlockSpec((tm, h_pad), lambda i, k: (i, 0)),
        out_shape=jax.ShapeDtypeStruct((n_pad, h_pad), out_dtype),
        scratch_shapes=[pltpu.VMEM((tm, h_pad), jnp.float32)],
        compiler_params=pltpu.CompilerParams(
            dimension_semantics=("parallel", "arbitrary"),
            vmem_limit_bytes=_VMEM_LIMIT),
    )(a_bf16, xw_bf16, b_f32)


def _decoder(z_f32, *, out_dtype, tm):
    n_pad, o_pad = z_f32.shape
    return pl.pallas_call(
        _decoder_kernel,
        grid=(n_pad // tm, n_pad // tm),
        in_specs=[
            pl.BlockSpec((tm, o_pad), lambda i, j: (i, 0)),
            pl.BlockSpec((tm, o_pad), lambda i, j: (j, 0)),
        ],
        out_specs=pl.BlockSpec((tm, tm), lambda i, j: (i, j)),
        out_shape=jax.ShapeDtypeStruct((n_pad, n_pad), out_dtype),
        compiler_params=pltpu.CompilerParams(
            dimension_semantics=("parallel", "parallel"),
            vmem_limit_bytes=_VMEM_LIMIT),
    )(z_f32, z_f32)


def linkpred_forward(a_hat, x, w1, b1, w2, b2, *, tile=None, adj_dtype=jnp.bfloat16):
    """Forward pass of LinkPredNet. Returns (adj_pred, z) with original (unpadded) shapes.

    tile: node-dimension tile (used for tm, tk and the decoder tile, so n_pad is a
      multiple of all of them). Default: 512 (amortizes the ~0.35us/step overhead and
      runs near HBM roofline on v5e/v6e/v7x), shrunk for tiny graphs so they don't
      over-pad. For large graphs keep n_pad//tile >= 2 so both v7x TensorCores get work.
    adj_dtype: bf16 by default — the decoder is N^2-writeback bound, bf16 halves it.
    """
    n, in_ch = x.shape
    hidden = w1.shape[1]
    out_ch = w2.shape[1]

    if tile is None:
        tile = min(512, _round_up(n, _LANE))
    assert tile % _LANE == 0, "tile must be a multiple of 128"

    n_pad = _round_up(n, tile)
    din_pad = _round_up(in_ch, _LANE)
    hid_pad = _round_up(hidden, _LANE)
    out_pad = _round_up(out_ch, _LANE)

    # Cast MXU operands to bf16 *before* padding (single cheap pass; avoids an extra
    # full f32 N^2 pad pass for A). Accumulation and elementwise math stay f32.
    a_p = _pad_to(a_hat.astype(jnp.bfloat16), (n_pad, n_pad))
    x_p = _pad_to(x.astype(jnp.bfloat16), (n_pad, din_pad))
    w1_p = _pad_to(w1.astype(jnp.bfloat16), (din_pad, hid_pad))
    b1_p = _pad_to(b1.reshape(1, -1).astype(jnp.float32), (1, hid_pad))
    w2_p = _pad_to(w2.astype(jnp.bfloat16), (hid_pad, out_pad))
    b2_p = _pad_to(b2.reshape(1, -1).astype(jnp.float32), (1, out_pad))

    # Layer 1: h1 = relu(A_hat @ (x @ W1) + b1); XW hoisted, h1 stored bf16.
    xw1 = _feature_transform(x_p, w1_p, tm=tile)
    h1 = _gcn_propagate(a_p, xw1, b1_p, apply_relu=True,
                        out_dtype=jnp.bfloat16, tm=tile, tk=tile)
    # Layer 2: z = A_hat @ (h1 @ W2) + b2; z stored f32 (returned to caller).
    xw2 = _feature_transform(h1, w2_p, tm=tile)
    z_pad = _gcn_propagate(a_p, xw2, b2_p, apply_relu=False,
                           out_dtype=jnp.float32, tm=tile, tk=tile)
    # Decoder: adj = sigmoid(z @ z^T); per-tile bf16 cast inside the kernel.
    adj_pad = _decoder(z_pad, out_dtype=adj_dtype, tm=tile)

    # NOTE: padded node rows of h1 / z contain relu(b1) / b2 (A's padded columns are
    # zero, so they never contaminate real rows); they are sliced off here.
    return adj_pad[:n, :n], z_pad[:n, :out_ch]


# ---------------------------------------------------------------------------
# Graph / parameter helpers (glue, plain JAX)
# ---------------------------------------------------------------------------

def build_normalized_adjacency(edge_index, num_nodes, dtype=jnp.bfloat16):
    """Dense A_hat = D^-1/2 (A + I) D^-1/2, matching PyG GCNConv gcn_norm.
    A[dst, src] = 1 per edge src->dst. Assumes deduplicated edges and no
    pre-existing self-loops. Built in f32, returned directly in `dtype` (bf16 by
    default) so the wrapper never makes an extra full-f32 N^2 pass."""
    src, dst = edge_index[0], edge_index[1]
    a = jnp.zeros((num_nodes, num_nodes), jnp.float32)
    a = a.at[dst, src].set(1.0)
    a = a + jnp.eye(num_nodes, dtype=jnp.float32)
    deg = jnp.sum(a, axis=1)
    d_inv_sqrt = jnp.where(deg > 0, 1.0 / jnp.sqrt(deg), 0.0)
    return (d_inv_sqrt[:, None] * a * d_inv_sqrt[None, :]).astype(dtype)


def glorot(key, shape):
    fan_in, fan_out = shape
    limit = jnp.sqrt(6.0 / (fan_in + fan_out))
    return jax.random.uniform(key, shape, jnp.float32, -limit, limit)


def _bf16_path_reference(a_hat, x, w1, b1, w2, b2):
    """Pure-JAX reference following the same bf16-operand / f32-accumulate path."""
    bf = jnp.bfloat16
    a_bf = a_hat.astype(bf)
    xw1 = jnp.dot(x.astype(bf), w1.astype(bf), preferred_element_type=jnp.float32)
    h1 = jnp.maximum(
        jnp.dot(a_bf, xw1.astype(bf), preferred_element_type=jnp.float32)
        + b1.reshape(1, -1), 0.0).astype(bf)
    hw2 = jnp.dot(h1, w2.astype(bf), preferred_element_type=jnp.float32)
    z = (jnp.dot(a_bf, hw2.astype(bf), preferred_element_type=jnp.float32)
         + b2.reshape(1, -1))
    zb = z.astype(bf)
    logits = lax.dot_general(zb, zb, (((1,), (1,)), ((), ())),
                             preferred_element_type=jnp.float32)
    return jax.nn.sigmoid(logits), z


def _run_check(n, in_ch, hidden, out_ch, seed=0, tile=None, adj_dtype=jnp.bfloat16):
    key = jax.random.PRNGKey(seed)
    kx, kw1, kw2, kb1, kb2 = jax.random.split(key, 5)

    x = jax.random.normal(kx, (n, in_ch), jnp.float32)
    # Deterministic undirected ring graph (both directions per edge).
    src = jnp.arange(n, dtype=jnp.int32)
    dst = (src + 1) % n
    edge_index = jnp.stack(
        [jnp.concatenate([src, dst]), jnp.concatenate([dst, src])], axis=0)

    w1 = glorot(kw1, (in_ch, hidden))
    b1 = 0.1 * jax.random.normal(kb1, (hidden,), jnp.float32)
    w2 = glorot(kw2, (hidden, out_ch))
    b2 = 0.1 * jax.random.normal(kb2, (out_ch,), jnp.float32)

    a_hat = build_normalized_adjacency(edge_index, n)   # bf16

    adj_pred, z = linkpred_forward(a_hat, x, w1, b1, w2, b2,
                                   tile=tile, adj_dtype=adj_dtype)
    jax.block_until_ready((adj_pred, z))
    assert adj_pred.shape == (n, n) and z.shape == (n, out_ch)
    assert adj_pred.dtype == adj_dtype

    adj_f32 = adj_pred.astype(jnp.float32)

    # Tight check against a reference following the same precision path.
    adj_ref, z_ref = _bf16_path_reference(a_hat, x, w1, b1, w2, b2)
    assert jnp.allclose(z, z_ref, atol=2e-3, rtol=2e-3), "z mismatch (bf16 path)"
    assert jnp.allclose(adj_f32, adj_ref, atol=1e-2, rtol=1e-2), "adj mismatch (bf16 path)"

    # Loose check against full-f32 math of the original module (same quantized A_hat).
    a_f = a_hat.astype(jnp.float32)
    h1_f = jnp.maximum(a_f @ (x @ w1) + b1.reshape(1, -1), 0.0)
    z_f = a_f @ (h1_f @ w2) + b2.reshape(1, -1)
    adj_f = jax.nn.sigmoid(z_f @ z_f.T)
    assert jnp.allclose(z, z_f, atol=5e-2, rtol=5e-2), "z mismatch (f32 semantics)"
    assert jnp.allclose(adj_f32, adj_f, atol=5e-2, rtol=5e-2), "adj mismatch (f32 semantics)"


if __name__ == "__main__":
    # Small shapes consistent with the module: N nodes, in=get_numdims, hidden, out.
    _run_check(n=16, in_ch=8, hidden=32, out_ch=16, seed=0)        # single-tile path
    _run_check(n=200, in_ch=8, hidden=32, out_ch=16, seed=0)       # adaptive tile path
    _run_check(n=300, in_ch=8, hidden=32, out_ch=16, seed=0,       # multi-tile K-accum +
               tile=128, adj_dtype=jnp.float32)                    # multi-tile decoder, f32 adj
    print("KERNEL_OK")
</pallas_src>

<mosaic_0001>
module attributes {stable_mosaic.version = 11 : i64} {
  func.func @_xw_kernel(%arg0: i32, %arg1: memref<128x128xbf16, #tpu.memory_space<vmem>>, %arg2: memref<128x128xbf16, #tpu.memory_space<vmem>>, %arg3: memref<128x128xbf16, #tpu.memory_space<vmem>>) attributes {dimension_semantics = [#tpu.dimension_semantics<parallel>], iteration_bounds = array<i64: 1>, scalar_prefetch = 0 : i64, scratch_operands = 0 : i64, tpu.core_type = #tpu.core_type<tc>, window_params = [{transform_indices = @transform_0, window_bounds = array<i64: 128, 128>}, {pipeline_mode = #tpu.pipeline_mode<synchronous>, transform_indices = @transform_1, window_bounds = array<i64: 128, 128>}, {transform_indices = @transform_2, window_bounds = array<i64: 128, 128>}]} {
    %c0 = arith.constant 0 : index
    %c0_0 = arith.constant 0 : index
    %0 = vector.load %arg1[%c0, %c0_0] : memref<128x128xbf16, #tpu.memory_space<vmem>>, vector<128x128xbf16>
    %c0_1 = arith.constant 0 : index
    %c0_2 = arith.constant 0 : index
    %1 = vector.load %arg2[%c0_1, %c0_2] : memref<128x128xbf16, #tpu.memory_space<vmem>>, vector<128x128xbf16>
    %cst = arith.constant dense<0.000000e+00> : vector<128x128xf32>
    %2 = tpu.matmul %0, %1, %cst {dimension_numbers = #tpu.dot_dimension_numbers<[1], [0], [0], [1], [0, 0, 1, 1], [], []>} : vector<128x128xbf16>, vector<128x128xbf16>, vector<128x128xf32> -> vector<128x128xf32>
    %3 = arith.truncf %2 : vector<128x128xf32> to vector<128x128xbf16>
    %c0_3 = arith.constant 0 : index
    %c0_4 = arith.constant 0 : index
    %4 = vector.load %arg3[%c0_3, %c0_4] : memref<128x128xbf16, #tpu.memory_space<vmem>>, vector<128x128xbf16>
    tpu.vector_store %arg3[%c0_3, %c0_4], %3 {strides = array<i32>} : memref<128x128xbf16, #tpu.memory_space<vmem>>, vector<128x128xbf16>,
    return
  }
  func.func @transform_0(%arg0: i32) -> (i32, i32) {
    %c0_i32 = arith.constant 0 : i32
    %c0_i32_0 = arith.constant 0 : i32
    return %arg0, %c0_i32 : i32, i32
  }
  func.func @transform_1(%arg0: i32) -> (i32, i32) {
    %c0_i32 = arith.constant 0 : i32
    %c0_i32_0 = arith.constant 0 : i32
    %c0_i32_1 = arith.constant 0 : i32
    return %c0_i32, %c0_i32_0 : i32, i32
  }
  func.func @transform_2(%arg0: i32) -> (i32, i32) {
    %c0_i32 = arith.constant 0 : i32
    %c0_i32_0 = arith.constant 0 : i32
    return %arg0, %c0_i32 : i32, i32
  }
}

</mosaic_0001>

<bundles_post_ra>
// kernel: tpu_custom_call.1
= control target key start
LH: loop header
LB: loop body
LE: loop exit
PB: predicated region body
PF: predicated region fallthrough
CT: control target
= control target key end

     0   :  { %7 = vsyncpa [#allocation3], 0  ;;  %s681_s0 = inlined_call_operand.hbm [shape: bf16[128,128], index: 0, kind: input, shape index: {}]   ;;  %s682_s1 = inlined_call_operand.hbm [shape: bf16[128,128], index: 1, kind: input, shape index: {}]   ;;  %s683_s2 = inlined_call_operand.hbm [shape: bf16[128,128], index: 2, kind: output, shape index: {}]  }
   0x1   :  { %8 = vsyncpa [#allocation6], 0 }
   0x2   :  { %9 = vsyncpa [#allocation4], 0  ;;  %s616_s9 = smov [#allocation2]   ;;  %s544_s13 = scalar_lea.hbm %s681_s0, 1024 }
   0x3   :  { %s15_s10 = sshll.u32 %s616_s9, 4  ;;  %p545_p0 = scmp.ne.s32.totalorder %s681_s0, %s544_s13  ;;  %s16_s10 = int_to_ptr.vmem [resolvable:$true] %s15_s10 }
   0x4   :  { %p548_p1 = scmp.lt.u32.totalorder %s544_s13, %s681_s0 }
   0x6   :  { %p550_p2 = pnand %p548_p1, %p545_p0 }
   0x8   :  { %553 = shalt.err (!%p550_p2)
}
   0x9   :  { %s554_s18 = scalar_lea.vmem %s16_s10, 1024  ;;  %p559_p4 = scmp.lt.s32.totalorder %s16_s10, %s16_s10 }
   0xa   :  { %p555_p3 = scmp.ne.s32.totalorder %s16_s10, %s554_s18  ;;  %p560_p5 = scmp.lt.s32.totalorder %s554_s18, %s554_s18 }
   0xc   :  { %p561_p6 = por %p560_p5, %p559_p4 }
   0xe   :  { %p562_p7 = pnand %p561_p6, %p555_p3 }
  0x10   :  { %565 = shalt.err (!%p562_p7)
}
  0x11   :  { %s617_s19 = smov 64   ;;  %s618_s20 = smov 4  }
  0x12   :  { %21 = dma.hbm_to_vmem [thread:$0]  %s681_s0, 1024, %s16_s10, [#allocation3], %s617_s19, %s617_s19, %s618_s20  }
  0x13   :  { %s619_s23 = smov [#allocation5]   ;;  %s566_s27 = scalar_lea.hbm %s682_s1, 1024 }
  0x14   :  { %s27_s24 = sshll.u32 %s619_s23, 4  ;;  %p567_p8 = scmp.ne.s32.totalorder %s682_s1, %s566_s27  ;;  %s28_s24 = int_to_ptr.vmem [resolvable:$true] %s27_s24 }
  0x15   :  { %p570_p9 = scmp.lt.u32.totalorder %s566_s27, %s682_s1 }
  0x17   :  { %p572_p10 = pnand %p570_p9, %p567_p8 }
  0x19   :  { %575 = shalt.err (!%p572_p10)
}
  0x1a   :  { %s576_s4 = scalar_lea.vmem %s28_s24, 1024  ;;  %p581_p12 = scmp.lt.s32.totalorder %s28_s24, %s28_s24 }
  0x1b   :  { %p577_p11 = scmp.ne.s32.totalorder %s28_s24, %s576_s4  ;;  %p582_p13 = scmp.lt.s32.totalorder %s576_s4, %s576_s4 }
  0x1d   :  { %p583_p0 = por %p582_p13, %p581_p12 }
  0x1f   :  { %p584_p1 = pnand %p583_p0, %p577_p11 }
  0x21   :  { %587 = shalt.err (!%p584_p1)
}
  0x22   :  { %33 = dma.hbm_to_vmem [thread:$0]  %s682_s1, 1024, %s28_s24, [#allocation6], %s617_s19, %s617_s19, %s618_s20  }
  0x23   :  { %610 = dma.done.wait [#allocation3], 1024  }
  0x24   :  { %611 = vsyncadd [#allocation3], 4294966272 }
  0x25   :  { %612 = dma.done.wait [#allocation6], 1024  }
  0x26   :  { %613 = vsyncadd [#allocation6], 4294966272  ;;  %v528_v0 = vld [vmem:[#allocation5] sm:$0xff]   ;;  %v529_v1 = vld [vmem:[#allocation5 + $0x8] sm:$0xff]   ;;  %s620_s1 = smov [#allocation7]  }
  0x27   :  { %475 = vmatprep.subr.bf16.mxu0 %v528_v0  ;;  %507 = vmatprep.subr.bf16.mxu1 %v528_v0  ;;  %v530_v2 = vld [vmem:[#allocation5 + $0x10] sm:$0xff]   ;;  %v531_v3 = vld [vmem:[#allocation5 + $0x18] sm:$0xff]   ;;  %v536_v4 = vld [vmem:[#allocation2] sm:$0xff]   ;;  %s351_s6 = sshll.u32 %s620_s1, 4  ;;  %s352_s6 = int_to_ptr.vmem [resolvable:$true] %s351_s6 }
  0x28   :  { %476 = vmatpush3.bf16.msra.mxu0 %v528_v0  ;;  %515 = vmatpush3.bf16.msra.mxu1 %v528_v0  ;;  %v537_v5 = vld [vmem:[#allocation2 + $0x20] sm:$0xff]   ;;  %v533_v7 = vld [vmem:[#allocation5 + $0x28] sm:$0xff]   ;;  %v534_v8 = vld [vmem:[#allocation5 + $0x30] sm:$0xff]   ;;  %s588_s7 = scalar_lea.vmem %s352_s6, 1024  ;;  %p593_p3 = scmp.lt.s32.totalorder %s352_s6, %s352_s6 }
  0x29   :  { %477 = vmatprep.subr.bf16.mxu0 %v529_v1  ;;  %508 = vmatprep.subr.bf16.mxu1 %v529_v1  ;;  %v532_v6 = vld [vmem:[#allocation5 + $0x20] sm:$0xff]   ;;  %v535_v9 = vld [vmem:[#allocation5 + $0x38] sm:$0xff]   ;;  %v538_v10 = vld [vmem:[#allocation2 + $0x8] sm:$0xff]   ;;  %p589_p2 = scmp.ne.s32.totalorder %s352_s6, %s588_s7  ;;  %p594_p4 = scmp.lt.s32.totalorder %s588_s7, %s588_s7 }
  0x2a   :  { %491 = vmatprep.mubr.bf16.mxu0 %v536_v4  ;;  %499 = vmatprep.mubr.bf16.mxu1 %v537_v5  ;;  %v539_v11 = vld [vmem:[#allocation2 + $0x28] sm:$0xff]   ;;  %v540_v12 = vld [vmem:[#allocation2 + $0x10] sm:$0xff]   ;;  %v542_v14 = vld [vmem:[#allocation2 + $0x18] sm:$0xff]  }
  0x2b   :  { %v541_v13 = vld [vmem:[#allocation2 + $0x30] sm:$0xff]   ;;  %v543_v15 = vld [vmem:[#allocation2 + $0x38] sm:$0xff]   ;;  %p595_p5 = por %p594_p4, %p593_p3 }
  0x2c   :  { %478 = vmatpush3.bf16.msra.mxu0 %v529_v1  ;;  %516 = vmatpush3.bf16.msra.mxu1 %v529_v1 }
  0x2d   :  { %479 = vmatprep.subr.bf16.mxu0 %v530_v2  ;;  %509 = vmatprep.subr.bf16.mxu1 %v530_v2  ;;  %p596_p6 = pnand %p595_p5, %p589_p2 }
  0x30   :  { %480 = vmatpush3.bf16.msra.mxu0 %v530_v2  ;;  %517 = vmatpush3.bf16.msra.mxu1 %v530_v2 }
  0x31   :  { %481 = vmatprep.subr.bf16.mxu0 %v531_v3  ;;  %510 = vmatprep.subr.bf16.mxu1 %v531_v3 }
  0x34   :  { %482 = vmatpush3.bf16.msra.mxu0 %v531_v3  ;;  %518 = vmatpush3.bf16.msra.mxu1 %v531_v3 }
  0x35   :  { %483 = vmatprep.subr.bf16.mxu0 %v532_v6  ;;  %511 = vmatprep.subr.bf16.mxu1 %v532_v6 }
  0x38   :  { %484 = vmatpush3.bf16.msra.mxu0 %v532_v6  ;;  %519 = vmatpush3.bf16.msra.mxu1 %v532_v6 }
  0x39   :  { %485 = vmatprep.subr.bf16.mxu0 %v533_v7  ;;  %512 = vmatprep.subr.bf16.mxu1 %v533_v7 }
  0x3c   :  { %486 = vmatpush3.bf16.msra.mxu0 %v533_v7  ;;  %520 = vmatpush3.bf16.msra.mxu1 %v533_v7 }
  0x3d   :  { %487 = vmatprep.subr.bf16.mxu0 %v534_v8  ;;  %513 = vmatprep.subr.bf16.mxu1 %v534_v8 }
  0x40   :  { %488 = vmatpush3.bf16.msra.mxu0 %v534_v8  ;;  %521 = vmatpush3.bf16.msra.mxu1 %v534_v8 }
  0x41   :  { %489 = vmatprep.subr.bf16.mxu0 %v535_v9  ;;  %514 = vmatprep.subr.bf16.mxu1 %v535_v9 }
  0x44   :  { %490 = vmatpush3.bf16.msra.mxu0 %v535_v9  ;;  %522 = vmatpush3.bf16.msra.mxu1 %v535_v9 }
  0x47   :  { %492 = vmatmul.mubr.bf16.vlgmr.msra.gmra.mrb[0].mxu0 %v538_v10  ;;  %500 = vmatmul.mubr.bf16.vlgmr.msra.gmra.mrb[0].mxu1 %v539_v11 }
  0x48   :  { %495 = vmatprep.mubr.bf16.mxu0 %v540_v12  ;;  %503 = vmatprep.mubr.bf16.mxu1 %v541_v13 }
  0x4f   :  { %496 = vmatmul.mubr.bf16.gmra.mrb[4].mxu0 %v542_v14  ;;  %504 = vmatmul.mubr.bf16.gmra.mrb[4].mxu1 %v543_v15 }
 0x11a   :  { %v493_v16 = vpop.f32.mrb[0].mxu0  ;;  %v501_v17 = vpop.f32.mrb[0].mxu1 }
 0x11b   :  { %v203_v18 = vpop.f32.mrb[1].mxu0  ;;  %v235_v19 = vpop.f32.mrb[1].mxu1 }
 0x11c   :  { %v494_v20 = vpop.f32.mrb[2].mxu0  ;;  %v502_v21 = vpop.f32.mrb[2].mxu1 }
 0x11d   :  { %v420_v22 = vpack.c.bf16 %v494_v20, %v493_v16  ;;  %v440_v23 = vpack.c.bf16 %v502_v21, %v501_v17  ;;  %v206_v24 = vpop.f32.mrb[3].mxu0  ;;  %v238_v25 = vpop.f32.mrb[3].mxu1 }
 0x11e   :  { %v415_v26 = vpack.c.bf16 %v206_v24, %v203_v18  ;;  %v435_v27 = vpack.c.bf16 %v238_v25, %v235_v19 }
 0x11f   :  { %452 = vst [vmem:[#allocation7 + $0x8] sm:$0xff] %v420_v22   ;;  %456 = vst [vmem:[#allocation7 + $0x28] sm:$0xff] %v440_v23  }
 0x120   :  { %416 = vst [vmem:[#allocation7] sm:$0xff] %v415_v26   ;;  %455 = vst [vmem:[#allocation7 + $0x20] sm:$0xff] %v435_v27  }
 0x122   :  { %v497_v28 = vpop.f32.mrb[4].mxu0  ;;  %v505_v29 = vpop.f32.mrb[4].mxu1 }
 0x123   :  { %v219_v30 = vpop.f32.mrb[5].mxu0  ;;  %v251_v31 = vpop.f32.mrb[5].mxu1 }
 0x124   :  { %v498_v32 = vpop.f32.mrb[6].mxu0  ;;  %v506_v33 = vpop.f32.mrb[6].mxu1 }
 0x125   :  { %v430_v34 = vpack.c.bf16 %v498_v32, %v497_v28  ;;  %v450_v35 = vpack.c.bf16 %v506_v33, %v505_v29  ;;  %v222_v36 = vpop.f32.mrb[7].mxu0  ;;  %v254_v37 = vpop.f32.mrb[7].mxu1 }
 0x126   :  { %v425_v38 = vpack.c.bf16 %v222_v36, %v219_v30  ;;  %v445_v39 = vpack.c.bf16 %v254_v37, %v251_v31 }
 0x127   :  { %454 = vst [vmem:[#allocation7 + $0x18] sm:$0xff] %v430_v34   ;;  %458 = vst [vmem:[#allocation7 + $0x38] sm:$0xff] %v450_v35  }
 0x128   :  { %453 = vst [vmem:[#allocation7 + $0x10] sm:$0xff] %v425_v38   ;;  %457 = vst [vmem:[#allocation7 + $0x30] sm:$0xff] %v445_v39  }
 0x129   :  { %599 = shalt.err (!%p596_p6)
}
 0x12a   :  { %s600_s10 = scalar_lea.hbm %s683_s2, 1024 }
 0x12b   :  { %p601_p7 = scmp.ne.s32.totalorder %s683_s2, %s600_s10  ;;  %p604_p8 = scmp.lt.u32.totalorder %s600_s10, %s683_s2 }
 0x12d   :  { %p606_p9 = pnand %p604_p8, %p601_p7 }
 0x12f   :  { %609 = shalt.err (!%p606_p9)
}
 0x130   :  { %357 = dma.vmem_to_hbm [thread:$0]  %s352_s6, 1024, %s683_s2, [#allocation4], %s617_s19, %s617_s19, %s618_s20  }
 0x131   :  { %614 = dma.done.wait [#allocation4], 1024  }
 0x132   :  { %615 = vsyncadd [#allocation4], 4294966272 }
 0x133   :  { %361 = vsyncpa [#allocation3], 1 }
 0x134   :  { %362 = vsyncpa [#allocation6], 1 }
 0x135   :  { %363 = vsyncpa [#allocation4], 1 }

</bundles_post_ra>
